<compile_context>
chip_gen: v6e
topology: v6e:2x2x1
jax: 0.10.0
libtpu: 0.0.40
codegen_flags: <defaults>
</compile_context>

<pallas_src>
import jax
import jax.numpy as jnp
from jax.experimental import pallas as pl
from jax.experimental.pallas import tpu as pltpu

_LANES = 128                   # vreg lane width: block last dim must be a multiple of 128
_ROW_TILE_MAX = 2048           # 2048*128*4 B = 1 MiB per buffer (sweepable 1024-2048)
_MIN_GRID_STEPS = 4            # keep the grid shardable across v7x's 2 TensorCores
_PALLAS_MIN_ELEMS = 64 * 1024  # below this, dispatch overhead dominates -> fused XLA


def net_kernel(w1_ref, w2_ref, x_ref, o_ref):
    # w1_ref / w2_ref: (1, 1) f32 scalars in SMEM (fc1.weight, fc2.weight)
    # x_ref / o_ref  : (row_tile, 128) lane-dense f32 tiles in VMEM
    w1 = w1_ref[0, 0]
    w2 = w2_ref[0, 0]
    z1 = x_ref[...] * w1              # fc1: Linear(1, 1, bias=False) == scalar mul (VPU)
    a1 = jnp.maximum(z1, 0.0)         # ReLU
    # TODO(synk): the in-forward `fc1.weight.data[0] = uncorrupted` restore is a
    # parameter-mutation side effect (and the print()s are host I/O) with no
    # output-affecting Pallas equivalent; the forward result is unchanged by it.
    o_ref[...] = a1 * w2              # fc2: Linear(1, 1, bias=False) == scalar mul (VPU)


def _xla_forward(x, w1, w2):
    # Single fused elementwise pass — already at the HBM roofline.
    return jnp.maximum(x * w1[0, 0], 0.0) * w2[0, 0]


def _pick_row_tile(rows):
    # Multiple of 8 sublanes, capped at _ROW_TILE_MAX, and small enough that the grid
    # keeps >= _MIN_GRID_STEPS steps for megacore ("parallel") sharding on v7x.
    t = min(_ROW_TILE_MAX, max(8, rows // _MIN_GRID_STEPS))
    return max(8, (t // 8) * 8)


def _net_forward_pallas(x, w1, w2):
    """Copy-free lane-dense Pallas path; requires x.size % 128 == 0."""
    orig_shape = x.shape
    n = x.size
    rows = n // _LANES
    slab = x.reshape(rows, _LANES)        # zero-copy reshape: no extra HBM pass
    row_tile = _pick_row_tile(rows)
    grid = (pl.cdiv(rows, row_tile),)     # ragged last block is masked by Pallas

    out = pl.pallas_call(
        net_kernel,
        out_shape=jax.ShapeDtypeStruct((rows, _LANES), x.dtype),
        grid=grid,
        in_specs=[
            pl.BlockSpec(memory_space=pltpu.MemorySpace.SMEM),    # w1 (1,1) scalar
            pl.BlockSpec(memory_space=pltpu.MemorySpace.SMEM),    # w2 (1,1) scalar
            pl.BlockSpec((row_tile, _LANES), lambda i: (i, 0)),   # x tile (lane-dense)
        ],
        out_specs=pl.BlockSpec((row_tile, _LANES), lambda i: (i, 0)),
        compiler_params=pltpu.CompilerParams(
            dimension_semantics=("parallel",),   # shard grid steps across TCs on v7x
        ),
    )(w1, w2, slab)

    return out.reshape(orig_shape)        # zero-copy reshape back to (B, 1)


def _net_forward(x, w1, w2):
    """x: (B, 1) f32; w1, w2: (1, 1) f32 -> (B, 1) f32  (== fc2(relu(fc1(x))))."""
    if x.size < _PALLAS_MIN_ELEMS or x.size % _LANES != 0:
        # Tiny batches: a Pallas dispatch is pure overhead for < a few vregs of work.
        # Non-128-aligned batches: feeding Pallas would need pad/slice/concat copies
        # (each a full HBM pass), so the single fused XLA pass is strictly faster.
        return _xla_forward(x, w1, w2)
    return _net_forward_pallas(x, w1, w2)


net_forward = jax.jit(_net_forward)


if __name__ == "__main__":
    # Deterministic parameters exactly as in Net.__init__:
    #   fc1.weight = [[1.0]], fc2.weight = [[2.0]]
    w1 = jnp.ones((1, 1), dtype=jnp.float32)
    w2 = jnp.full((1, 1), 2.0, dtype=jnp.float32)

    # Pallas path: 128-aligned batch that is NOT a multiple of the row tile, so it
    # exercises the zero-copy slab reshape, a multi-step "parallel" grid, and the
    # ragged (masked) last block.  rows = 520 -> row_tile = 128 -> grid = 5 steps.
    B = 520 * _LANES   # 66,560 elements
    x = jax.random.normal(jax.random.PRNGKey(0), (B, 1), dtype=jnp.float32)
    y = jax.block_until_ready(net_forward(x, w1, w2))
    y_ref = jnp.maximum(x @ w1.T, 0.0) @ w2.T
    assert y.shape == (B, 1)
    assert jnp.allclose(y, y_ref, atol=1e-6)

    # Fallback path: tiny batch -> single fused XLA pass (no Pallas dispatch).
    x_small = jax.random.normal(jax.random.PRNGKey(1), (8, 1), dtype=jnp.float32)
    y_small = jax.block_until_ready(net_forward(x_small, w1, w2))
    y_small_ref = jnp.maximum(x_small @ w1.T, 0.0) @ w2.T
    assert y_small.shape == (8, 1)
    assert jnp.allclose(y_small, y_small_ref, atol=1e-6)

    print("KERNEL_OK")
</pallas_src>

<mosaic_0001>
module attributes {stable_mosaic.version = 11 : i64} {
  func.func @net_kernel(%arg0: i32, %arg1: memref<1x1xf32, #tpu.memory_space<smem>>, %arg2: memref<1x1xf32, #tpu.memory_space<smem>>, %arg3: memref<128x128xf32, #tpu.memory_space<vmem>>, %arg4: memref<128x128xf32, #tpu.memory_space<vmem>>) attributes {dimension_semantics = [#tpu.dimension_semantics<parallel>], iteration_bounds = array<i64: 5>, scalar_prefetch = 0 : i64, scratch_operands = 0 : i64, tpu.core_type = #tpu.core_type<tc>, window_params = [{transform_indices = @transform_0, window_bounds = array<i64: 1, 1>}, {transform_indices = @transform_1, window_bounds = array<i64: 1, 1>}, {transform_indices = @transform_2, window_bounds = array<i64: 128, 128>}, {transform_indices = @transform_3, window_bounds = array<i64: 128, 128>}]} {
    %c0 = arith.constant 0 : index
    %c0_0 = arith.constant 0 : index
    %0 = memref.load %arg1[%c0, %c0_0] : memref<1x1xf32, #tpu.memory_space<smem>>
    %c0_1 = arith.constant 0 : index
    %c0_2 = arith.constant 0 : index
    %1 = memref.load %arg2[%c0_1, %c0_2] : memref<1x1xf32, #tpu.memory_space<smem>>
    %c0_3 = arith.constant 0 : index
    %c0_4 = arith.constant 0 : index
    %2 = vector.load %arg3[%c0_3, %c0_4] : memref<128x128xf32, #tpu.memory_space<vmem>>, vector<128x128xf32>
    %3 = vector.broadcast %0 : f32 to vector<128x128xf32>
    %4 = arith.mulf %2, %3 : vector<128x128xf32>
    %cst = arith.constant 0.000000e+00 : f32
    %5 = vector.broadcast %cst : f32 to vector<128x128xf32>
    %6 = arith.maximumf %4, %5 : vector<128x128xf32>
    %7 = vector.broadcast %1 : f32 to vector<128x128xf32>
    %8 = arith.mulf %6, %7 : vector<128x128xf32>
    %c0_5 = arith.constant 0 : index
    %c0_6 = arith.constant 0 : index
    %9 = vector.load %arg4[%c0_5, %c0_6] : memref<128x128xf32, #tpu.memory_space<vmem>>, vector<128x128xf32>
    tpu.vector_store %arg4[%c0_5, %c0_6], %8 {strides = array<i32>} : memref<128x128xf32, #tpu.memory_space<vmem>>, vector<128x128xf32>,
    return
  }
  func.func @transform_0(%arg0: i32) -> (i32, i32) {
    %c0_i32 = arith.constant 0 : i32
    %c0_i32_0 = arith.constant 0 : i32
    %c0_i32_1 = arith.constant 0 : i32
    return %c0_i32, %c0_i32_0 : i32, i32
  }
  func.func @transform_1(%arg0: i32) -> (i32, i32) {
    %c0_i32 = arith.constant 0 : i32
    %c0_i32_0 = arith.constant 0 : i32
    %c0_i32_1 = arith.constant 0 : i32
    return %c0_i32, %c0_i32_0 : i32, i32
  }
  func.func @transform_2(%arg0: i32) -> (i32, i32) {
    %c0_i32 = arith.constant 0 : i32
    %c0_i32_0 = arith.constant 0 : i32
    return %arg0, %c0_i32 : i32, i32
  }
  func.func @transform_3(%arg0: i32) -> (i32, i32) {
    %c0_i32 = arith.constant 0 : i32
    %c0_i32_0 = arith.constant 0 : i32
    return %arg0, %c0_i32 : i32, i32
  }
}

</mosaic_0001>

<bundles_post_ra>
// kernel: _net_forward.1
= control target key start
LH: loop header
LB: loop body
LE: loop exit
PB: predicated region body
PF: predicated region fallthrough
CT: control target
= control target key end

     0   :  { %s817_s0 = inlined_call_operand.<no memory space> [shape: f32[1,1], index: 0, kind: input, shape index: {}]   ;;  %s818_s1 = inlined_call_operand.<no memory space> [shape: f32[1,1], index: 1, kind: input, shape index: {}]   ;;  %s819_s2 = inlined_call_operand.hbm [shape: f32[520,128], index: 2, kind: input, shape index: {}]   ;;  %s820_s3 = inlined_call_operand.hbm [shape: f32[520,128], index: 3, kind: output, shape index: {}]  }
   0x1   :  { %8 = sst [smem:[#allocation2]] %s817_s0 }
   0x2   :  { %9 = sst [smem:[#allocation3]] %s818_s1 }
   0x3   :  { %10 = vsyncpa [#allocation5], 0 }
   0x4   :  { %12 = vsyncpa [#allocation5 + $0x1], 0 }
   0x5   :  { %13 = vsyncpa [#allocation6], 0 }
   0x6   :  { %15 = vsyncpa [#allocation6 + $0x1], 0  ;;  %s575_s16 = smov 0   ;;  %s577_s17 = smov 0  }
   0x7   :  { %s579_s18 = smov 0   ;;  %s581_s19 = smov 0  }
   0x8 LB: > { %s596_s0 = sadd.s32 4294967295, %s541_s19   ;;  %s384_s1 = sadd.s32 4294967294, %s541_s19   ;;  %s541_s19 = sphi %s581_s19, %s828_s19   ;;  %s537_s18 = sphi %s579_s18, %s827_s18   ;;  %s533_s17 = sphi %s577_s17, %s826_s17   ;;  %s529_s16 = sphi %s575_s16, %s825_s16  }
   0x9   : > { %s600_s20 = sadd.s32 1, %s541_s19   ;;  %s70_s21 = sadd.s32 1, %s537_s18 }
   0xa   : > { %s67_s22 = ssub.s32 %s541_s19, %s600_s20  ;;  %p77_p0 = scmp.ne.s32.totalorder %s537_s18, %s533_s17 }
   0xb   : > { %p68_p1 = scmp.eq.s32.totalorder %s67_s22, 0  ;;  %p78_p2 = scmp.eq.s32.totalorder %s541_s19, 0 }
   0xc   : > { %p83_p3 = scmp.ne.s32.totalorder %s533_s17, %s529_s16  ;;  %p84_p4 = scmp.eq.s32.totalorder %s596_s0, 0 }
   0xd   : > { %s612_s23 = scalar_select %p68_p1, %s537_s18, %s70_s21  }
   0xe   : > { %p79_p5 = por %p78_p2, %p77_p0  ;;  %p614_p6 = por %p84_p4, %p83_p3 }
   0xf   : > { %p107_p7 = scmp.eq.s32.totalorder %s596_s0, 4  ;;  %p113_p8 = scmp.eq.s32.totalorder %s384_s1, 4 }
  0x10   : > { %p386_p11 = scmp.ge.s32.totalorder %s541_s19, 5 }
  0x11   : > { %p619_p9 = por %p107_p7, %p77_p0  ;;  %p623_p10 = por %p113_p8, %p83_p3 }
  0x12   : > { %135 = sbr.rel (%p386_p11) target bundleno = 55 (0x37), region = 24 }
  0x13   : > { %s823_s26 = scalar_select %p623_p10, 1, 0 }
  0x17   : > { %138 = sbr.rel (!%p79_p5) target bundleno = 55 (0x37), region = 28  ;;  %s139_s27 = sand.u32 (%p79_p5), 1, %s537_s18  }
  0x18   : > { %s388_s28 = sshll.u32 (%p79_p5), %s541_s19, 4  ;;  %s387_s29 = sshll.u32 (%p79_p5), %s139_s27, 7 }
  0x19   : > { %s145_s30 = ssub.s32 (%p79_p5), 65, %s388_s28  ;;  %s633_s6 = scalar_lea.sflag (%p79_p5), [#allocation5], %s139_s27 }
  0x1a   : > { %p146_p12 = scmp.lt.s32.totalorder (%p79_p5), %s145_s30, 16  ;;  %s143_s7 = scalar_lea.vmem (%p79_p5), [#allocation4], %s387_s29 }
  0x1c   : > { %s830_s30 = smov (!%p146_p12, %s145_s30), 16 }
  0x1d   : > { %s630_s4 = sshll.u32 %s830_s30, 7 }
  0x1e   : > { %s150_s5 = ssub.s32 2048, %s630_s4 }
  0x1f   : > { %151 = vsyncadd %s633_s6, %s150_s5  ;;  %p390_p13 = scmp.ne.s32.totalorder %s630_s4, 0  ;;  %s406_s8 = sshll.u32 %s541_s19, 11 }
  0x20   : > { %s641_s11 = scalar_lea.hbm %s819_s2, %s406_s8  ;;  %s156_s12 = sshll.u32 %s143_s7, 4  ;;  %s643_s12 = int_to_ptr.vmem [resolvable:$true] %s156_s12 }
  0x21   : > { %s451_s13 = scalar_lea.hbm %s641_s11, %s630_s4  ;;  %s455_s1 = scalar_lea.hbm %s819_s2, 8320 }
  0x22   : > { %p452_p0 = scmp.ne.s32.totalorder %s641_s11, %s451_s13  ;;  %p456_p3 = scmp.lt.s32.totalorder %s641_s11, %s819_s2 }
  0x23   : > { %p457_p4 = scmp.lt.s32.totalorder %s455_s1, %s451_s13 }
  0x24   : > { %p453_p1 = pnand %p452_p0, %p390_p13 }
  0x25   : > { %p458_p5 = por %p457_p4, %p456_p3 }
  0x26   : > { %p454_p2 = pneg %p453_p1 }
  0x28   : > { %p459_p7 = pnand %p458_p5, %p454_p2 }
  0x2a   : > { %462 = shalt.err (!%p459_p7)
}
  0x2b   : > { %s463_s27 = scalar_lea.vmem %s643_s12, %s630_s4  ;;  %s543_s28 = smov [#allocation4]  }
  0x2c   : > { %p464_p8 = scmp.ne.s32.totalorder %s643_s12, %s463_s27  ;;  %s467_s29 = sshll.u32 %s543_s28, 4  ;;  %s468_s29 = int_to_ptr.vmem [resolvable:$false] %s467_s29 }
  0x2d   : > { %s469_s30 = scalar_lea.vmem %s468_s29, 4096  ;;  %p470_p0 = scmp.lt.s32.totalorder %s643_s12, %s468_s29 }
  0x2e   : > { %p465_p11 = pnand %p464_p8, %p390_p13  ;;  %p471_p1 = scmp.lt.s32.totalorder %s469_s30, %s463_s27 }
  0x30   : > { %p466_p12 = pneg %p465_p11  ;;  %p472_p10 = por %p471_p1, %p470_p0 }
  0x32   : > { %p473_p3 = pnand %p472_p10, %p466_p12 }
  0x34   : > { %476 = shalt.err (!%p473_p3)
}
  0x35   : > { %s544_s5 = smov 128   ;;  %s545_s7 = smov 8  }
  0x36   : > { %162 = dma.hbm_to_vmem [thread:$0]  (%p390_p13), %s641_s11, %s630_s4, %s643_s12, %s633_s6, %s544_s5, %s544_s5, %s545_s7  }
  0x37 PF: > { %p394_p2 = scmp.ge.s32.totalorder %s541_s19, 1  ;;  %p164_p4 = scmp.lt.s32.totalorder %s541_s19, 6 }
  0x39   : > { %p165_p5 = pnand %p394_p2, %p164_p4 }
  0x3a   : > { %s672_s8 = sand.u32 (!%p165_p5), 1, %s533_s17  }
  0x3b   : > { %168 = sbr.rel (%p165_p5) target bundleno = 115 (0x73), region = 32  ;;  %s395_s9 = sshll.u32 (!%p165_p5), %s672_s8, 7 }
  0x3c   : > { %s171_s10 = scalar_lea.sflag (!%p165_p5), [#allocation5], %s672_s8  ;;  %s678_s13 = scalar_lea.vmem (!%p165_p5), [#allocation4], %s395_s9 }
  0x40   : > { %520 = dma.done.wait (%p614_p6), %s171_s10, 2048  }
  0x41   : > { %522 = vsyncadd (%p614_p6), %s171_s10, 4294965248  ;;  %s207_s4 = sld [smem:[#allocation2]]  ;;  %v209_v0 = vld [vmem:[%s678_s13] sm:$0xff]  ;;  %v210_v2 = vld [vmem:[%s678_s13 + $0x8] sm:$0xff]  ;;  %s719_s24 = scalar_lea.vmem [#allocation7], %s395_s9 }
  0x42   : > { %s208_s6 = sld [smem:[#allocation3]]  ;;  %v211_v3 = vld [vmem:[%s678_s13 + $0x10] sm:$0xff]  ;;  %v212_v7 = vld [vmem:[%s678_s13 + $0x18] sm:$0xff]  ;;  %v213_v8 = vld [vmem:[%s678_s13 + $0x20] sm:$0xff]  ;;  %s292_s11 = scalar_lea.sflag [#allocation6], %s672_s8 }
  0x43   : > { %v214_v9 = vld [vmem:[%s678_s13 + $0x28] sm:$0xff]  ;;  %v215_v14 = vld [vmem:[%s678_s13 + $0x30] sm:$0xff]  ;;  %v216_v15 = vld [vmem:[%s678_s13 + $0x38] sm:$0xff]  ;;  %s398_s12 = sshll.u32 (%p619_p9), %s596_s0, 4 }
  0x44   : > { %v217_v24 = vld [vmem:[%s678_s13 + $0x40] sm:$0xff]  ;;  %v218_v25 = vld [vmem:[%s678_s13 + $0x48] sm:$0xff]  ;;  %v219_v26 = vld [vmem:[%s678_s13 + $0x50] sm:$0xff]  ;;  %s300_s14 = ssub.s32 (%p619_p9), 65, %s398_s12 }
  0x45   : > { %v220_v31 = vld [vmem:[%s678_s13 + $0x58] sm:$0xff]  ;;  %v221_v32 = vld [vmem:[%s678_s13 + $0x60] sm:$0xff]  ;;  %v222_v33 = vld [vmem:[%s678_s13 + $0x68] sm:$0xff]  ;;  %p301_p6 = scmp.lt.s32.totalorder (%p619_p9), %s300_s14, 16 }
  0x46   : > { %v223_v38 = vld [vmem:[%s678_s13 + $0x70] sm:$0xff]  ;;  %v224_v43 = vld [vmem:[%s678_s13 + $0x78] sm:$0xff] }
  0x47   : > { %v685_v1 = vstv %s207_s4 }
  0x48   : > { %v226_v4 = vmul.f32 %v685_v1, %v209_v0  ;;  %v227_v5 = vmul.f32 %v685_v1, %v210_v2  ;;  %v228_v6 = vmul.f32 %v685_v1, %v211_v3  ;;  %v695_v10 = vstv %s208_s6 }
  0x49   : > { %v229_v11 = vmul.f32 %v685_v1, %v212_v7  ;;  %v230_v12 = vmul.f32 %v685_v1, %v213_v8  ;;  %v231_v13 = vmul.f32 %v685_v1, %v214_v9  ;;  %v232_v19 = vmul.f32 %v685_v1, %v215_v14 }
  0x4a   : > { %v242_v16 = vmax.f32 %v226_v4, 0.0  ;;  %v243_v17 = vmax.f32 %v227_v5, 0.0  ;;  %v244_v18 = vmax.f32 %v228_v6, 0.0  ;;  %v233_v23 = vmul.f32 %v685_v1, %v216_v15 }
  0x4b   : > { %v245_v20 = vmax.f32 %v229_v11, 0.0  ;;  %v246_v21 = vmax.f32 %v230_v12, 0.0  ;;  %v247_v22 = vmax.f32 %v231_v13, 0.0  ;;  %v248_v30 = vmax.f32 %v232_v19, 0.0 }
  0x4c   : > { %v259_v27 = vmul.f32 %v695_v10, %v242_v16  ;;  %v260_v28 = vmul.f32 %v695_v10, %v243_v17  ;;  %v261_v29 = vmul.f32 %v695_v10, %v244_v18  ;;  %v249_v37 = vmax.f32 %v233_v23, 0.0 }
  0x4d   : > { %v262_v34 = vmul.f32 %v695_v10, %v245_v20  ;;  %v263_v35 = vmul.f32 %v695_v10, %v246_v21  ;;  %v264_v36 = vmul.f32 %v695_v10, %v247_v22  ;;  %v265_v39 = vmul.f32 %v695_v10, %v248_v30 }
  0x4e   : > { %275 = vst [vmem:[%s719_s24] sm:$0xff] %v259_v27  ;;  %276 = vst [vmem:[%s719_s24 + $0x8] sm:$0xff] %v260_v28  ;;  %v234_v40 = vmul.f32 %v685_v1, %v217_v24  ;;  %v235_v41 = vmul.f32 %v685_v1, %v218_v25  ;;  %v236_v42 = vmul.f32 %v685_v1, %v219_v26 }
  0x4f   : > { %277 = vst [vmem:[%s719_s24 + $0x10] sm:$0xff] %v261_v29  ;;  %278 = vst [vmem:[%s719_s24 + $0x18] sm:$0xff] %v262_v34  ;;  %v266_v44 = vmul.f32 %v695_v10, %v249_v37  ;;  %v237_v45 = vmul.f32 %v685_v1, %v220_v31  ;;  %v238_v46 = vmul.f32 %v685_v1, %v221_v32 }
  0x50   : > { %279 = vst [vmem:[%s719_s24 + $0x20] sm:$0xff] %v263_v35  ;;  %280 = vst [vmem:[%s719_s24 + $0x28] sm:$0xff] %v264_v36  ;;  %v239_v47 = vmul.f32 %v685_v1, %v222_v33  ;;  %v250_v48 = vmax.f32 %v234_v40, 0.0  ;;  %v251_v49 = vmax.f32 %v235_v41, 0.0  ;;  %v252_v50 = vmax.f32 %v236_v42, 0.0 }
  0x51   : > { %281 = vst [vmem:[%s719_s24 + $0x30] sm:$0xff] %v265_v39  ;;  %v240_v51 = vmul.f32 %v685_v1, %v223_v38  ;;  %282 = vst [vmem:[%s719_s24 + $0x38] sm:$0xff] %v266_v44  ;;  %v253_v52 = vmax.f32 %v237_v45, 0.0  ;;  %v254_v53 = vmax.f32 %v238_v46, 0.0  ;;  %v241_v55 = vmul.f32 %v685_v1, %v224_v43 }
  0x52   : > { %v255_v54 = vmax.f32 %v239_v47, 0.0  ;;  %v267_v56 = vmul.f32 %v695_v10, %v250_v48  ;;  %v268_v57 = vmul.f32 %v695_v10, %v251_v49  ;;  %v269_v58 = vmul.f32 %v695_v10, %v252_v50 }
  0x53   : > { %v256_v59 = vmax.f32 %v240_v51, 0.0  ;;  %v270_v60 = vmul.f32 %v695_v10, %v253_v52  ;;  %v271_v61 = vmul.f32 %v695_v10, %v254_v53  ;;  %v257_v63 = vmax.f32 %v241_v55, 0.0  ;;  %298 = sbr.rel (!%p619_p9) target bundleno = 115 (0x73), region = 40 }
  0x54   : > { %v272_v62 = vmul.f32 %v695_v10, %v255_v54  ;;  %283 = vst [vmem:[%s719_s24 + $0x40] sm:$0xff] %v267_v56  ;;  %284 = vst [vmem:[%s719_s24 + $0x48] sm:$0xff] %v268_v57 }
  0x55   : > { %285 = vst [vmem:[%s719_s24 + $0x50] sm:$0xff] %v269_v58  ;;  %v273_v0 = vmul.f32 %v695_v10, %v256_v59  ;;  %286 = vst [vmem:[%s719_s24 + $0x58] sm:$0xff] %v270_v60  ;;  %v274_v1 = vmul.f32 %v695_v10, %v257_v63 }
  0x56   : > { %287 = vst [vmem:[%s719_s24 + $0x60] sm:$0xff] %v271_v61  ;;  %288 = vst [vmem:[%s719_s24 + $0x68] sm:$0xff] %v272_v62 }
  0x57   : > { %289 = vst [vmem:[%s719_s24 + $0x70] sm:$0xff] %v273_v0  ;;  %290 = vst [vmem:[%s719_s24 + $0x78] sm:$0xff] %v274_v1 }
  0x58   : > { %s832_s14 = smov (!%p301_p6, %s300_s14), 16 }
  0x59   : > { %s760_s15 = sshll.u32 %s832_s14, 7 }
  0x5a   : > { %s305_s1 = ssub.s32 2048, %s760_s15 }
  0x5b   : > { %306 = vsyncadd %s292_s11, %s305_s1  ;;  %p400_p10 = scmp.ne.s32.totalorder %s760_s15, 0  ;;  %s407_s25 = sshll.u32 %s596_s0, 11 }
  0x5c   : > { %s770_s27 = scalar_lea.hbm %s820_s3, %s407_s25  ;;  %s311_s28 = sshll.u32 %s719_s24, 4  ;;  %s773_s28 = int_to_ptr.vmem [resolvable:$true] %s311_s28 }
  0x5d   : > { %s477_s29 = scalar_lea.vmem %s773_s28, %s760_s15  ;;  %s546_s30 = smov [#allocation7]  }
  0x5e   : > { %p478_p9 = scmp.ne.s32.totalorder %s773_s28, %s477_s29  ;;  %s481_s5 = sshll.u32 %s546_s30, 4  ;;  %s482_s5 = int_to_ptr.vmem [resolvable:$false] %s481_s5 }
  0x5f   : > { %s483_s0 = scalar_lea.vmem %s482_s5, 4096  ;;  %p484_p8 = scmp.lt.s32.totalorder %s773_s28, %s482_s5 }
  0x60   : > { %p479_p13 = pnand %p478_p9, %p400_p10  ;;  %p485_p11 = scmp.lt.s32.totalorder %s483_s0, %s477_s29 }
  0x62   : > { %p480_p7 = pneg %p479_p13  ;;  %p486_p12 = por %p485_p11, %p484_p8 }
  0x64   : > { %p487_p0 = pnand %p486_p12, %p480_p7 }
  0x66   : > { %490 = shalt.err (!%p487_p0)
}
  0x67   : > { %s491_s7 = scalar_lea.hbm %s770_s27, %s760_s15  ;;  %s495_s13 = scalar_lea.hbm %s820_s3, 8320 }
  0x68   : > { %p492_p1 = scmp.ne.s32.totalorder %s770_s27, %s491_s7  ;;  %p496_p4 = scmp.lt.s32.totalorder %s770_s27, %s820_s3 }
  0x69   : > { %p497_p5 = scmp.lt.s32.totalorder %s495_s13, %s491_s7 }
  0x6a   : > { %p493_p3 = pnand %p492_p1, %p400_p10 }
  0x6b   : > { %p498_p6 = por %p497_p5, %p496_p4 }
  0x6c   : > { %p494_p2 = pneg %p493_p3 }
  0x6e   : > { %p499_p9 = pnand %p498_p6, %p494_p2 }
  0x70   : > { %502 = shalt.err (!%p499_p9)
}
  0x71   : > { %s547_s24 = smov 128   ;;  %s548_s12 = smov 8  }
  0x72   : > { %317 = dma.vmem_to_hbm [thread:$0]  (%p400_p10), %s773_s28, %s760_s15, %s770_s27, %s292_s11, %s547_s24, %s547_s24, %s548_s12  }
  0x73 PF: > { %p414_p13 = scmp.ge.s32.totalorder %s541_s19, 2  ;;  %s326_s14 = sand.u32 1, %s529_s16  }
  0x74   : > { %p824_p7 = scmp.ne.s32.totalorder %s823_s26, 0  ;;  %s327_s1 = scalar_lea.sflag [#allocation6], %s326_s14 }
  0x76   : > { %p411_p8 = pnand %p414_p13, %p824_p7 }
  0x78   : > { %p412_p11 = pneg %p411_p8 }
  0x7a   : > { %524 = dma.done.wait (%p412_p11), %s327_s1, 2048  }
  0x7b   : > { %526 = vsyncadd (%p412_p11), %s327_s1, 4294965248  ;;  %p18_p12 = scmp.ge.s32.totalorder %s600_s20, 7   ;;  %s825_s16 = smov %s533_s17 }
  0x7c   : > { %s826_s17 = smov %s537_s18  ;;  %s827_s18 = smov %s612_s23 }
  0x7d   : > { %s828_s19 = smov %s600_s20  ;;  %20 = sbr.rel (!%p18_p12) target bundleno = 8 (0x8), region = 77 }
  0x82   :  { %332 = vsyncpa [#allocation5], 1 }
  0x83   :  { %334 = vsyncpa [#allocation5 + $0x1], 1 }
  0x84   :  { %335 = vsyncpa [#allocation6], 1 }
  0x85   :  { %337 = vsyncpa [#allocation6 + $0x1], 1 }

</bundles_post_ra>
